<compile_context>
chip_gen: v7x
topology: tpu7x:2x2x1
jax: 0.10.0
libtpu: 0.0.40
codegen_flags: <defaults>
</compile_context>

<pallas_src>
import functools
import math

import jax
import jax.numpy as jnp
from jax import lax
from jax.experimental import pallas as pl
from jax.experimental.pallas import tpu as pltpu

NUM_GROUPS = 8
EPS = 1e-5


def _vmem_limit_bytes():
    """Generation-aware scoped-VMEM ceiling: ~60% of physical, capped at 64 MiB.
    v5e/v6e (128 MiB phys) -> 64 MiB; v7x (64 MiB phys) -> ~38 MiB."""
    cap = 128 * 1024 * 1024
    try:
        cap = int(getattr(pltpu.get_tpu_info(), "vmem_capacity_bytes", cap))
    except Exception:
        pass
    return min(int(cap * 0.6), 64 * 1024 * 1024)


def _pick_tile(n, preferred, multiple):
    """Largest tile <= preferred that divides n and is a multiple of `multiple`
    (falling back to multiples of 16 then 8); else the full extent n."""
    if n <= preferred:
        return n
    for m in (multiple, 16, 8):
        for cand in range(min(n, preferred), m - 1, -1):
            if cand % m == 0 and n % cand == 0:
                return cand
    return n


# --------------------------------------------------------------------------- #
# Kernel 1: GroupNorm statistics (reduction over N), tiled -> (B,1,C) scale/shift
# --------------------------------------------------------------------------- #
def _gn_stats_kernel(x_ref, memb_ref, membt_ref, gamma_ref, beta_ref,
                     scale_ref, shift_ref, sum_sc, sumsq_sc, *, inv_cnt):
    n = pl.program_id(1)

    @pl.when(n == 0)
    def _():
        sum_sc[...] = jnp.zeros_like(sum_sc)
        sumsq_sc[...] = jnp.zeros_like(sumsq_sc)

    x = x_ref[0]                                              # (tns, C) f32
    sum_sc[...] += jnp.sum(x, axis=0, keepdims=True)          # (1, C)
    sumsq_sc[...] += jnp.sum(x * x, axis=0, keepdims=True)    # (1, C)

    @pl.when(n == pl.num_programs(1) - 1)
    def _():
        memb = memb_ref[...]                                  # (C, G) 0/1 membership (const)
        membt = membt_ref[...]                                # (G, C)
        gsum = jnp.dot(sum_sc[...], memb, preferred_element_type=jnp.float32)     # (1, G)
        gsumsq = jnp.dot(sumsq_sc[...], memb, preferred_element_type=jnp.float32)
        gmean = gsum * inv_cnt
        gvar = gsumsq * inv_cnt - gmean * gmean
        mean_c = jnp.dot(gmean, membt, preferred_element_type=jnp.float32)        # (1, C)
        inv_std_c = lax.rsqrt(
            jnp.dot(gvar, membt, preferred_element_type=jnp.float32) + EPS)
        a = inv_std_c * gamma_ref[...]
        scale_ref[0] = a                                      # (1, C)
        shift_ref[0] = beta_ref[...] - mean_c * a             # (1, C)


# --------------------------------------------------------------------------- #
# Kernel 2: normalize + Q/K/V projections, tiled over N (fully parallel grid)
# --------------------------------------------------------------------------- #
def _norm_qkv_kernel(x_ref, scale_ref, shift_ref, wq_ref, wk_ref, wv_ref,
                     bq_ref, bk_ref, bv_ref, q_ref, k_ref, v_ref):
    xn = x_ref[0] * scale_ref[0] + shift_ref[0]               # (tn, C) f32, one FMA
    xb = xn.astype(jnp.bfloat16)
    # bf16 operands on the MXU, f32 accumulation; Wq/bq already carry the 1/sqrt(C) scale.
    q = jnp.dot(xb, wq_ref[...], preferred_element_type=jnp.float32) + bq_ref[...]
    k = jnp.dot(xb, wk_ref[...], preferred_element_type=jnp.float32) + bk_ref[...]
    v = jnp.dot(xb, wv_ref[...], preferred_element_type=jnp.float32) + bv_ref[...]
    q_ref[0] = q.astype(jnp.bfloat16)
    k_ref[0] = k.astype(jnp.bfloat16)
    v_ref[0] = v.astype(jnp.bfloat16)


# --------------------------------------------------------------------------- #
# Kernel 3: flash attention + output projection + residual
# grid = (B, num_q_tiles, num_kv_tiles); kv axis is the reduction ("arbitrary")
# --------------------------------------------------------------------------- #
def _flash_attn_proj_kernel(q_ref, k_ref, v_ref, xres_ref, wproj_ref, bproj_ref,
                            o_ref, m_sc, l_sc, acc_sc):
    kv = pl.program_id(2)

    @pl.when(kv == 0)
    def _():
        m_sc[...] = jnp.full_like(m_sc, -jnp.inf)
        l_sc[...] = jnp.zeros_like(l_sc)
        acc_sc[...] = jnp.zeros_like(acc_sc)

    q = q_ref[0]                                   # (tq, C) bf16, 1/sqrt(C) pre-folded
    k = k_ref[0]                                   # (tk, C) bf16
    v = v_ref[0]                                   # (tk, C) bf16

    # q @ k^T without an explicit transpose: contract both channel axes directly.
    s = lax.dot_general(q, k, (((1,), (1,)), ((), ())),
                        preferred_element_type=jnp.float32)          # (tq, tk) f32

    # m/l are kept lane-replicated in (tq, 128) scratch: full-width stores, no masked vst.
    m_prev = m_sc[...]                                                # (tq, 128)
    s_max = jnp.max(s, axis=-1, keepdims=True)                        # (tq, 1)
    m_next = jnp.maximum(m_prev, s_max)                               # (tq, 128) replicated
    m_prev_c = jnp.max(m_prev, axis=-1, keepdims=True)                # (tq, 1) (lanes equal)
    m_next_c = jnp.max(m_next, axis=-1, keepdims=True)                # (tq, 1)
    alpha_c = jnp.exp(m_prev_c - m_next_c)                            # (tq, 1)
    p = jnp.exp(s - m_next_c)                                         # (tq, tk)

    l_sc[...] = alpha_c * l_sc[...] + jnp.sum(p, axis=-1, keepdims=True)
    acc_sc[...] = alpha_c * acc_sc[...] + jnp.dot(
        p.astype(jnp.bfloat16), v, preferred_element_type=jnp.float32)
    m_sc[...] = m_next

    @pl.when(kv == pl.num_programs(2) - 1)
    def _():
        l_c = jnp.max(l_sc[...], axis=-1, keepdims=True)              # (tq, 1)
        attn_out = acc_sc[...] * pl.reciprocal(l_c, approx=True)      # (tq, C) f32
        proj = jnp.dot(attn_out.astype(jnp.bfloat16), wproj_ref[...],
                       preferred_element_type=jnp.float32) + bproj_ref[...]
        o_ref[0] = xres_ref[0] + proj              # residual add stays in f32


# --------------------------------------------------------------------------- #
# Wrapper
# --------------------------------------------------------------------------- #
def attention_block(x_nchw, params):
    """x_nchw: (B, C, H, W) float32 -> (B, C, H, W) float32."""
    B, C, H, W = x_nchw.shape
    assert C % NUM_GROUPS == 0, "channels must be divisible by GroupNorm groups (8)"
    N = H * W
    vmem_limit = _vmem_limit_bytes()

    # NCHW -> (B, N, C) channels-last.
    # TODO(synk): if the surrounding model can stay channels-last, these two HBM transposes
    # (here and at the end) can be dropped entirely.
    x = jnp.transpose(x_nchw.reshape(B, C, N), (0, 2, 1)).astype(jnp.float32)

    gamma = params["gamma"].reshape(1, C).astype(jnp.float32)
    beta = params["beta"].reshape(1, C).astype(jnp.float32)
    w_qkv = params["w_qkv"].reshape(3 * C, C)
    b_qkv = params["b_qkv"].reshape(3 * C)
    attn_scale = 1.0 / math.sqrt(C)
    # Fold 1/sqrt(C) into Wq/bq at trace time (removes the in-kernel N*C multiply).
    wq_t = (w_qkv[0:C].T * attn_scale).astype(jnp.bfloat16)            # (C, C)
    wk_t = w_qkv[C:2 * C].T.astype(jnp.bfloat16)
    wv_t = w_qkv[2 * C:3 * C].T.astype(jnp.bfloat16)
    bq = (b_qkv[0:C] * attn_scale).reshape(1, C).astype(jnp.float32)
    bk = b_qkv[C:2 * C].reshape(1, C).astype(jnp.float32)
    bv = b_qkv[2 * C:3 * C].reshape(1, C).astype(jnp.float32)
    wproj_t = params["w_proj"].reshape(C, C).T.astype(jnp.bfloat16)
    bproj = params["b_proj"].reshape(1, C).astype(jnp.float32)

    # Compile-time constant GroupNorm membership matrices (hoisted out of the kernels).
    groups = jnp.arange(C, dtype=jnp.int32) // (C // NUM_GROUPS)
    memb = (groups[:, None] ==
            jnp.arange(NUM_GROUPS, dtype=jnp.int32)[None, :]).astype(jnp.float32)  # (C, G)
    membt = memb.T                                                                  # (G, C)

    # ---- kernel 1: GroupNorm statistics (tiled reduction over N) ---------- #
    tns = _pick_tile(N, 1024, 8)
    scale_bc, shift_bc = pl.pallas_call(
        functools.partial(_gn_stats_kernel,
                          inv_cnt=1.0 / float(N * (C // NUM_GROUPS))),
        out_shape=(jax.ShapeDtypeStruct((B, 1, C), jnp.float32),
                   jax.ShapeDtypeStruct((B, 1, C), jnp.float32)),
        grid_spec=pltpu.PrefetchScalarGridSpec(
            num_scalar_prefetch=0,
            grid=(B, N // tns),
            in_specs=[
                pl.BlockSpec((1, tns, C), lambda b, n: (b, n, 0)),       # x tile
                pl.BlockSpec((C, NUM_GROUPS), lambda b, n: (0, 0)),      # memb
                pl.BlockSpec((NUM_GROUPS, C), lambda b, n: (0, 0)),      # memb^T
                pl.BlockSpec((1, C), lambda b, n: (0, 0)),               # gamma
                pl.BlockSpec((1, C), lambda b, n: (0, 0)),               # beta
            ],
            out_specs=[
                pl.BlockSpec((1, 1, C), lambda b, n: (b, 0, 0)),         # scale row
                pl.BlockSpec((1, 1, C), lambda b, n: (b, 0, 0)),         # shift row
            ],
            scratch_shapes=[pltpu.VMEM((1, C), jnp.float32),
                            pltpu.VMEM((1, C), jnp.float32)],
        ),
        compiler_params=pltpu.CompilerParams(
            dimension_semantics=("parallel", "arbitrary"),
            vmem_limit_bytes=vmem_limit),
    )(x, memb, membt, gamma, beta)

    # ---- kernel 2: normalize + QKV (tiled over N, fully parallel) --------- #
    tn = _pick_tile(N, 512, 16)
    q, k, v = pl.pallas_call(
        _norm_qkv_kernel,
        out_shape=tuple(jax.ShapeDtypeStruct((B, N, C), jnp.bfloat16) for _ in range(3)),
        grid_spec=pltpu.PrefetchScalarGridSpec(
            num_scalar_prefetch=0,
            grid=(B, N // tn),
            in_specs=[
                pl.BlockSpec((1, tn, C), lambda b, n: (b, n, 0)),        # x tile
                pl.BlockSpec((1, 1, C), lambda b, n: (b, 0, 0)),         # scale row
                pl.BlockSpec((1, 1, C), lambda b, n: (b, 0, 0)),         # shift row
                pl.BlockSpec((C, C), lambda b, n: (0, 0)),               # Wq^T (pre-scaled)
                pl.BlockSpec((C, C), lambda b, n: (0, 0)),               # Wk^T
                pl.BlockSpec((C, C), lambda b, n: (0, 0)),               # Wv^T
                pl.BlockSpec((1, C), lambda b, n: (0, 0)),               # bq (pre-scaled)
                pl.BlockSpec((1, C), lambda b, n: (0, 0)),               # bk
                pl.BlockSpec((1, C), lambda b, n: (0, 0)),               # bv
            ],
            out_specs=[pl.BlockSpec((1, tn, C), lambda b, n: (b, n, 0))] * 3,
        ),
        compiler_params=pltpu.CompilerParams(
            dimension_semantics=("parallel", "parallel"),
            vmem_limit_bytes=vmem_limit),
    )(x, scale_bc, shift_bc, wq_t, wk_t, wv_t, bq, bk, bv)

    # ---- kernel 3: flash attention + projection + residual ---------------- #
    tq = _pick_tile(N, 512, 16)     # larger q tile raises K/V-stream arithmetic intensity
    tk = _pick_tile(N, 512, 128)    # lane-dense (tq, tk) logits when possible
    nq, nk = N // tq, N // tk

    out = pl.pallas_call(
        _flash_attn_proj_kernel,
        out_shape=jax.ShapeDtypeStruct((B, N, C), jnp.float32),
        grid_spec=pltpu.PrefetchScalarGridSpec(
            num_scalar_prefetch=0,
            grid=(B, nq, nk),
            in_specs=[
                pl.BlockSpec((1, tq, C), lambda b, qi, ki: (b, qi, 0)),   # q (bf16)
                pl.BlockSpec((1, tk, C), lambda b, qi, ki: (b, ki, 0)),   # k (bf16)
                pl.BlockSpec((1, tk, C), lambda b, qi, ki: (b, ki, 0)),   # v (bf16)
                pl.BlockSpec((1, tq, C), lambda b, qi, ki: (b, qi, 0)),   # x residual (f32)
                pl.BlockSpec((C, C), lambda b, qi, ki: (0, 0)),           # Wproj^T (bf16)
                pl.BlockSpec((1, C), lambda b, qi, ki: (0, 0)),           # bproj (f32)
            ],
            out_specs=pl.BlockSpec((1, tq, C), lambda b, qi, ki: (b, qi, 0)),
            scratch_shapes=[
                pltpu.VMEM((tq, 128), jnp.float32),   # running max (lane-replicated)
                pltpu.VMEM((tq, 128), jnp.float32),   # running denom (lane-replicated)
                pltpu.VMEM((tq, C), jnp.float32),     # output accumulator
            ],
        ),
        compiler_params=pltpu.CompilerParams(
            dimension_semantics=("parallel", "parallel", "arbitrary"),
            vmem_limit_bytes=vmem_limit),
    )(q, k, v, x, wproj_t, bproj)

    # (B, N, C) -> NCHW
    return jnp.transpose(out, (0, 2, 1)).reshape(B, C, H, W)


# --------------------------------------------------------------------------- #
# Params / reference / test
# --------------------------------------------------------------------------- #
def init_params(key, channels):
    C = channels
    k1, k2, k3, k4, k5, k6 = jax.random.split(key, 6)
    return {
        "gamma": jax.random.normal(k1, (C,), jnp.float32) * 0.1 + 1.0,
        "beta": jax.random.normal(k2, (C,), jnp.float32) * 0.1,
        "w_qkv": jax.random.normal(k3, (3 * C, C), jnp.float32) * 0.05,
        "b_qkv": jax.random.normal(k4, (3 * C,), jnp.float32) * 0.05,
        "w_proj": jax.random.normal(k5, (C, C), jnp.float32) * 0.05,
        "b_proj": jax.random.normal(k6, (C,), jnp.float32) * 0.05,
    }


def attention_block_ref(x, params):
    """Pure-JAX f32 reference mirroring the PyTorch forward (for verification)."""
    B, C, H, W = x.shape
    N = H * W
    xg = x.reshape(B, NUM_GROUPS, C // NUM_GROUPS, H, W)
    mean = jnp.mean(xg, axis=(2, 3, 4), keepdims=True)
    var = jnp.mean((xg - mean) ** 2, axis=(2, 3, 4), keepdims=True)
    xn = ((xg - mean) / jnp.sqrt(var + EPS)).reshape(B, C, H, W)
    xn = xn * params["gamma"].reshape(1, C, 1, 1) + params["beta"].reshape(1, C, 1, 1)

    qkv = jnp.einsum("bchw,oc->bohw", xn, params["w_qkv"]) \
        + params["b_qkv"].reshape(1, -1, 1, 1)
    q, k, v = jnp.split(qkv, 3, axis=1)
    q = q.reshape(B, C, N).transpose(0, 2, 1)
    k = k.reshape(B, C, N).transpose(0, 2, 1)
    v = v.reshape(B, C, N).transpose(0, 2, 1)
    attn = jnp.einsum("bnc,bmc->bnm", q, k) / math.sqrt(C)
    attn = jax.nn.softmax(attn, axis=-1)
    out = jnp.einsum("bnm,bmc->bnc", attn, v)
    out = out.transpose(0, 2, 1).reshape(B, C, H, W)
    out = jnp.einsum("bchw,oc->bohw", out, params["w_proj"]) \
        + params["b_proj"].reshape(1, -1, 1, 1)
    return x + out


if __name__ == "__main__":
    key = jax.random.PRNGKey(0)
    kx, kp = jax.random.split(key)

    B, C, H, W = 2, 32, 8, 8          # C must be divisible by 8 (GroupNorm groups)
    x = jax.random.normal(kx, (B, C, H, W), jnp.float32)
    params = init_params(kp, C)

    y = attention_block(x, params)
    y = jax.block_until_ready(y)

    y_ref = attention_block_ref(x, params)
    assert y.shape == x.shape
    max_err = jnp.max(jnp.abs(y - y_ref))
    # bf16 MXU operands + approx reciprocal -> relaxed tolerance vs the pure-f32 reference
    assert jnp.allclose(y, y_ref, atol=2e-2, rtol=2e-2), f"max abs err {max_err}"
    print("KERNEL_OK")
</pallas_src>

<mosaic_0001>
module attributes {stable_mosaic.version = 11 : i64} {
  func.func @_gn_stats_kernel(%arg0: i32, %arg1: i32, %arg2: memref<1x64x32xf32, #tpu.memory_space<vmem>>, %arg3: memref<32x8xf32, #tpu.memory_space<vmem>>, %arg4: memref<8x32xf32, #tpu.memory_space<vmem>>, %arg5: memref<1x32xf32, #tpu.memory_space<vmem>>, %arg6: memref<1x32xf32, #tpu.memory_space<vmem>>, %arg7: memref<1x1x32xf32, #tpu.memory_space<vmem>>, %arg8: memref<1x1x32xf32, #tpu.memory_space<vmem>>, %arg9: memref<1x32xf32, #tpu.memory_space<vmem>>, %arg10: memref<1x32xf32, #tpu.memory_space<vmem>>) attributes {dimension_semantics = [#tpu.dimension_semantics<parallel>, #tpu.dimension_semantics<arbitrary>], iteration_bounds = array<i64: 2, 1>, scalar_prefetch = 0 : i64, scratch_operands = 2 : i64, tpu.core_type = #tpu.core_type<tc>, window_params = [{transform_indices = @transform_0, window_bounds = array<i64: 1, 64, 32>}, {pipeline_mode = #tpu.pipeline_mode<synchronous>, transform_indices = @transform_1, window_bounds = array<i64: 32, 8>}, {pipeline_mode = #tpu.pipeline_mode<synchronous>, transform_indices = @transform_2, window_bounds = array<i64: 8, 32>}, {pipeline_mode = #tpu.pipeline_mode<synchronous>, transform_indices = @transform_3, window_bounds = array<i64: 1, 32>}, {pipeline_mode = #tpu.pipeline_mode<synchronous>, transform_indices = @transform_4, window_bounds = array<i64: 1, 32>}, {transform_indices = @transform_5, window_bounds = array<i64: 1, 1, 32>}, {transform_indices = @transform_6, window_bounds = array<i64: 1, 1, 32>}]} {
    %c0_i32 = arith.constant 0 : i32
    %0 = arith.cmpi eq, %arg1, %c0_i32 : i32
    %1 = arith.extui %0 : i1 to i32
    %c0_i32_0 = arith.constant 0 : i32
    %2 = arith.cmpi ne, %1, %c0_i32_0 : i32
    scf.if %2 {
      %cst_14 = arith.constant 0.000000e+00 : f32
      %19 = vector.broadcast %cst_14 : f32 to vector<1x32xf32>
      %c0_15 = arith.constant 0 : index
      %c0_16 = arith.constant 0 : index
      %20 = vector.load %arg9[%c0_15, %c0_16] : memref<1x32xf32, #tpu.memory_space<vmem>>, vector<1x32xf32>
      tpu.vector_store %arg9[%c0_15, %c0_16], %19 {strides = array<i32>} : memref<1x32xf32, #tpu.memory_space<vmem>>, vector<1x32xf32>,
      %cst_17 = arith.constant 0.000000e+00 : f32
      %21 = vector.broadcast %cst_17 : f32 to vector<1x32xf32>
      %c0_18 = arith.constant 0 : index
      %c0_19 = arith.constant 0 : index
      %22 = vector.load %arg10[%c0_18, %c0_19] : memref<1x32xf32, #tpu.memory_space<vmem>>, vector<1x32xf32>
      tpu.vector_store %arg10[%c0_18, %c0_19], %21 {strides = array<i32>} : memref<1x32xf32, #tpu.memory_space<vmem>>, vector<1x32xf32>,
    } else {
    }
    %c0 = arith.constant 0 : index
    %c0_1 = arith.constant 0 : index
    %c0_2 = arith.constant 0 : index
    %3 = vector.load %arg2[%c0, %c0_1, %c0_2] : memref<1x64x32xf32, #tpu.memory_space<vmem>>, vector<1x64x32xf32>
    %4 = vector.shape_cast %3 : vector<1x64x32xf32> to vector<64x32xf32>
    %c0_3 = arith.constant 0 : index
    %c0_4 = arith.constant 0 : index
    %5 = vector.load %arg9[%c0_3, %c0_4] : memref<1x32xf32, #tpu.memory_space<vmem>>, vector<1x32xf32>
    %cst = arith.constant dense<0.000000e+00> : vector<32xf32>
    %6 = vector.multi_reduction <add>, %4, %cst [0] : vector<64x32xf32> to vector<32xf32>
    %7 = vector.shape_cast %6 : vector<32xf32> to vector<1x32xf32>
    %8 = arith.addf %5, %7 : vector<1x32xf32>
    %c0_5 = arith.constant 0 : index
    %c0_6 = arith.constant 0 : index
    %9 = vector.load %arg9[%c0_5, %c0_6] : memref<1x32xf32, #tpu.memory_space<vmem>>, vector<1x32xf32>
    tpu.vector_store %arg9[%c0_5, %c0_6], %8 {strides = array<i32>} : memref<1x32xf32, #tpu.memory_space<vmem>>, vector<1x32xf32>,
    %c0_7 = arith.constant 0 : index
    %c0_8 = arith.constant 0 : index
    %10 = vector.load %arg10[%c0_7, %c0_8] : memref<1x32xf32, #tpu.memory_space<vmem>>, vector<1x32xf32>
    %11 = arith.mulf %4, %4 : vector<64x32xf32>
    %cst_9 = arith.constant dense<0.000000e+00> : vector<32xf32>
    %12 = vector.multi_reduction <add>, %11, %cst_9 [0] : vector<64x32xf32> to vector<32xf32>
    %13 = vector.shape_cast %12 : vector<32xf32> to vector<1x32xf32>
    %14 = arith.addf %10, %13 : vector<1x32xf32>
    %c0_10 = arith.constant 0 : index
    %c0_11 = arith.constant 0 : index
    %15 = vector.load %arg10[%c0_10, %c0_11] : memref<1x32xf32, #tpu.memory_space<vmem>>, vector<1x32xf32>
    tpu.vector_store %arg10[%c0_10, %c0_11], %14 {strides = array<i32>} : memref<1x32xf32, #tpu.memory_space<vmem>>, vector<1x32xf32>,
    %c0_i32_12 = arith.constant 0 : i32
    %16 = arith.cmpi eq, %arg1, %c0_i32_12 : i32
    %17 = arith.extui %16 : i1 to i32
    %c0_i32_13 = arith.constant 0 : i32
    %18 = arith.cmpi ne, %17, %c0_i32_13 : i32
    scf.if %18 {
      %c0_14 = arith.constant 0 : index
      %c0_15 = arith.constant 0 : index
      %19 = vector.load %arg3[%c0_14, %c0_15] : memref<32x8xf32, #tpu.memory_space<vmem>>, vector<32x8xf32>
      %c0_16 = arith.constant 0 : index
      %c0_17 = arith.constant 0 : index
      %20 = vector.load %arg4[%c0_16, %c0_17] : memref<8x32xf32, #tpu.memory_space<vmem>>, vector<8x32xf32>
      %c0_18 = arith.constant 0 : index
      %c0_19 = arith.constant 0 : index
      %21 = vector.load %arg9[%c0_18, %c0_19] : memref<1x32xf32, #tpu.memory_space<vmem>>, vector<1x32xf32>
      %cst_20 = arith.constant dense<0.000000e+00> : vector<1x8xf32>
      %22 = tpu.matmul %21, %19, %cst_20 {dimension_numbers = #tpu.dot_dimension_numbers<[1], [0], [0], [1], [0, 0, 1, 1], [], []>} : vector<1x32xf32>, vector<32x8xf32>, vector<1x8xf32> -> vector<1x8xf32>
      %c0_21 = arith.constant 0 : index
      %c0_22 = arith.constant 0 : index
      %23 = vector.load %arg10[%c0_21, %c0_22] : memref<1x32xf32, #tpu.memory_space<vmem>>, vector<1x32xf32>
      %cst_23 = arith.constant dense<0.000000e+00> : vector<1x8xf32>
      %24 = tpu.matmul %23, %19, %cst_23 {dimension_numbers = #tpu.dot_dimension_numbers<[1], [0], [0], [1], [0, 0, 1, 1], [], []>} : vector<1x32xf32>, vector<32x8xf32>, vector<1x8xf32> -> vector<1x8xf32>
      %cst_24 = arith.constant 3.906250e-03 : f32
      %25 = vector.broadcast %cst_24 : f32 to vector<1x8xf32>
      %26 = arith.mulf %22, %25 : vector<1x8xf32>
      %cst_25 = arith.constant 3.906250e-03 : f32
      %27 = vector.broadcast %cst_25 : f32 to vector<1x8xf32>
      %28 = arith.mulf %24, %27 : vector<1x8xf32>
      %29 = arith.mulf %26, %26 : vector<1x8xf32>
      %30 = arith.subf %28, %29 : vector<1x8xf32>
      %cst_26 = arith.constant dense<0.000000e+00> : vector<1x32xf32>
      %31 = tpu.matmul %26, %20, %cst_26 {dimension_numbers = #tpu.dot_dimension_numbers<[1], [0], [0], [1], [0, 0, 1, 1], [], []>} : vector<1x8xf32>, vector<8x32xf32>, vector<1x32xf32> -> vector<1x32xf32>
      %cst_27 = arith.constant dense<0.000000e+00> : vector<1x32xf32>
      %32 = tpu.matmul %30, %20, %cst_27 {dimension_numbers = #tpu.dot_dimension_numbers<[1], [0], [0], [1], [0, 0, 1, 1], [], []>} : vector<1x8xf32>, vector<8x32xf32>, vector<1x32xf32> -> vector<1x32xf32>
      %cst_28 = arith.constant 9.99999974E-6 : f32
      %33 = vector.broadcast %cst_28 : f32 to vector<1x32xf32>
      %34 = arith.addf %32, %33 : vector<1x32xf32>
      %35 = math.rsqrt %34 : vector<1x32xf32>
      %c0_29 = arith.constant 0 : index
      %c0_30 = arith.constant 0 : index
      %36 = vector.load %arg5[%c0_29, %c0_30] : memref<1x32xf32, #tpu.memory_space<vmem>>, vector<1x32xf32>
      %37 = arith.mulf %35, %36 : vector<1x32xf32>
      %c0_31 = arith.constant 0 : index
      %c0_32 = arith.constant 0 : index
      %c0_33 = arith.constant 0 : index
      %38 = vector.load %arg7[%c0_31, %c0_32, %c0_33] : memref<1x1x32xf32, #tpu.memory_space<vmem>>, vector<1x1x32xf32>
      %39 = vector.shape_cast %38 : vector<1x1x32xf32> to vector<1x32xf32>
      %40 = vector.shape_cast %37 : vector<1x32xf32> to vector<1x1x32xf32>
      tpu.vector_store %arg7[%c0_31, %c0_32, %c0_33], %40 {strides = array<i32>} : memref<1x1x32xf32, #tpu.memory_space<vmem>>, vector<1x1x32xf32>,
      %c0_34 = arith.constant 0 : index
      %c0_35 = arith.constant 0 : index
      %41 = vector.load %arg6[%c0_34, %c0_35] : memref<1x32xf32, #tpu.memory_space<vmem>>, vector<1x32xf32>
      %42 = arith.mulf %31, %37 : vector<1x32xf32>
      %43 = arith.subf %41, %42 : vector<1x32xf32>
      %c0_36 = arith.constant 0 : index
      %c0_37 = arith.constant 0 : index
      %c0_38 = arith.constant 0 : index
      %44 = vector.load %arg8[%c0_36, %c0_37, %c0_38] : memref<1x1x32xf32, #tpu.memory_space<vmem>>, vector<1x1x32xf32>
      %45 = vector.shape_cast %44 : vector<1x1x32xf32> to vector<1x32xf32>
      %46 = vector.shape_cast %43 : vector<1x32xf32> to vector<1x1x32xf32>
      tpu.vector_store %arg8[%c0_36, %c0_37, %c0_38], %46 {strides = array<i32>} : memref<1x1x32xf32, #tpu.memory_space<vmem>>, vector<1x1x32xf32>,
    } else {
    }
    return
  }
  func.func @transform_0(%arg0: i32, %arg1: i32) -> (i32, i32, i32) {
    %c0_i32 = arith.constant 0 : i32
    %c0_i32_0 = arith.constant 0 : i32
    return %arg0, %arg1, %c0_i32 : i32, i32, i32
  }
  func.func @transform_1(%arg0: i32, %arg1: i32) -> (i32, i32) {
    %c0_i32 = arith.constant 0 : i32
    %c0_i32_0 = arith.constant 0 : i32
    %c0_i32_1 = arith.constant 0 : i32
    return %c0_i32, %c0_i32_0 : i32, i32
  }
  func.func @transform_2(%arg0: i32, %arg1: i32) -> (i32, i32) {
    %c0_i32 = arith.constant 0 : i32
    %c0_i32_0 = arith.constant 0 : i32
    %c0_i32_1 = arith.constant 0 : i32
    return %c0_i32, %c0_i32_0 : i32, i32
  }
  func.func @transform_3(%arg0: i32, %arg1: i32) -> (i32, i32) {
    %c0_i32 = arith.constant 0 : i32
    %c0_i32_0 = arith.constant 0 : i32
    %c0_i32_1 = arith.constant 0 : i32
    return %c0_i32, %c0_i32_0 : i32, i32
  }
  func.func @transform_4(%arg0: i32, %arg1: i32) -> (i32, i32) {
    %c0_i32 = arith.constant 0 : i32
    %c0_i32_0 = arith.constant 0 : i32
    %c0_i32_1 = arith.constant 0 : i32
    return %c0_i32, %c0_i32_0 : i32, i32
  }
  func.func @transform_5(%arg0: i32, %arg1: i32) -> (i32, i32, i32) {
    %c0_i32 = arith.constant 0 : i32
    %c0_i32_0 = arith.constant 0 : i32
    %c0_i32_1 = arith.constant 0 : i32
    return %arg0, %c0_i32, %c0_i32_0 : i32, i32, i32
  }
  func.func @transform_6(%arg0: i32, %arg1: i32) -> (i32, i32, i32) {
    %c0_i32 = arith.constant 0 : i32
    %c0_i32_0 = arith.constant 0 : i32
    %c0_i32_1 = arith.constant 0 : i32
    return %arg0, %c0_i32, %c0_i32_0 : i32, i32, i32
  }
}

</mosaic_0001>

<bundles_post_ra>
// kernel: tpu_custom_call.1
= control target key start
LH: loop header
LB: loop body
LE: loop exit
PB: predicated region body
PF: predicated region fallthrough
CT: control target
= control target key end

     0   :  { %s1812_s0 = inlined_call_operand.hbm [shape: f32[2,64,32], index: 0, kind: input, shape index: {}]   ;;  %s1813_s1 = inlined_call_operand.hbm [shape: f32[32,8], index: 1, kind: input, shape index: {}]   ;;  %s1814_s2 = inlined_call_operand.hbm [shape: f32[8,32], index: 2, kind: input, shape index: {}]   ;;  %s1815_s3 = inlined_call_operand.hbm [shape: f32[1,32], index: 3, kind: input, shape index: {}]   ;;  %s1816_s4 = inlined_call_operand.hbm [shape: f32[1,32], index: 4, kind: input, shape index: {}]   ;;  %s1817_s5 = inlined_call_operand.hbm [shape: f32[2,1,32], index: 5, kind: output, shape index: {0}]   ;;  %s1818_s6 = inlined_call_operand.hbm [shape: f32[2,1,32], index: 6, kind: output, shape index: {1}]  }
   0x1   :  { %1826 = sst [smem:[#allocation23_spill]] %s1818_s6 }
   0x2   :  { %12 = vsyncpa [#allocation5], 0 }
   0x3   :  { %14 = vsyncpa [#allocation5 + $0x1], 0 }
   0x4   :  { %15 = vsyncpa [#allocation8], 0 }
   0x5   :  { %16 = vsyncpa [#allocation11], 0 }
   0x6   :  { %17 = vsyncpa [#allocation6], 0 }
   0x7   :  { %19 = vsyncpa [#allocation6 + $0x1], 0 }
   0x8   :  { %20 = vsyncpa [#allocation15], 0 }
   0x9   :  { %22 = vsyncpa [#allocation15 + $0x1], 0  ;;  %s1421_s21 = smov 0   ;;  %s1423_s22 = smov 0  }
   0xa   :  { %s1425_s23 = smov 0   ;;  %s1427_s24 = smov 0  }
   0xb   :  { %s1429_s25 = smov 0   ;;  %s1431_s26 = smov 0  }
   0xc LB: > { %1827 = sst [smem:[#allocation21_spill]] %s1352_s21  ;;  %s909_s27 = sadd.s32 4294967295, %s1372_s26   ;;  %s1372_s26 = sphi %s1431_s26, %s28_s26   ;;  %s1368_s25 = sphi %s1429_s25, %s1851_s25   ;;  %s1364_s24 = sphi %s1427_s24, %s1850_s24   ;;  %s1360_s23 = sphi %s1425_s23, %s1849_s23   ;;  %s1356_s22 = sphi %s1423_s22, %s1848_s22   ;;  %s1352_s21 = sphi %s1421_s21, %s1847_s21  }
   0xd   : > { %s910_s28 = sadd.s32 4294967294, %s1372_s26   ;;  %p62_p0 = scmp.ne.s32.totalorder %s1356_s22, %s1352_s21 }
   0xe   : > { %p1455_p1 = scmp.eq.s32.totalorder %s909_s27, 0  ;;  %p1459_p2 = scmp.eq.s32.totalorder %s909_s27, 1 }
   0xf   : > { %p176_p3 = scmp.eq.s32.totalorder %s910_s28, 1  ;;  %p911_p5 = scmp.ge.s32.totalorder %s1372_s26, 1 }
  0x10   : > { %s1828_s29 = scalar_select %p1455_p1, 1, 0 }
  0x11   : > { %s1829_s30 = scalar_select %p1459_p2, 1, 0 }
  0x12   : > { %p1465_p4 = por %p1455_p1, %p62_p0  ;;  %p1470_p6 = por %p176_p3, %p62_p0 }
  0x13   : > { %p209_p7 = scmp.lt.s32.totalorder %s1372_s26, 3  ;;  %s1374_s10 = smov [#allocation7]  }
  0x14   : > { %s1830_s7 = scalar_select %p1465_p4, 1, 0 }
  0x15   : > { %s1831_s8 = scalar_select %p1470_p6, 1, 0 }
  0x16   : > { %p1475_p8 = pnand %p911_p5, %p209_p7  ;;  %s221_s11 = sshll.u32 %s1374_s10, 4  ;;  %s1479_s11 = int_to_ptr.vmem [resolvable:$true] %s221_s11 }
  0x17   : > { %1832 = sst [smem:[#allocation22_spill]] %s1831_s8  ;;  %s1375_s13 = smov [#allocation10]  }
  0x18   : > { %s1833_s9 = scalar_select %p1475_p8, 1, 0 }
  0x19   : > { %p1015_p9 = pneg %p1475_p8  ;;  %s246_s14 = sshll.u32 %s1375_s13, 4  ;;  %s1490_s14 = int_to_ptr.vmem [resolvable:$true] %s246_s14 }
  0x1a   : > { %s1376_s15 = smov [#allocation9]   ;;  %s1108_s19 = scalar_lea.hbm %s1813_s1, 512 }
  0x1b   : > { %p1486_p11 = pnand %p1015_p9, %p1455_p1  ;;  %s1492_s16 = sshll.u32 %s1376_s15, 4  ;;  %s236_s16 = int_to_ptr.vmem [resolvable:$true] %s1492_s16 }
  0x1c   : > { %p1109_p12 = scmp.ne.s32.totalorder %s1813_s1, %s1108_s19  ;;  %p1115_p5 = scmp.lt.u32.totalorder %s1108_s19, %s1813_s1 }
  0x1d   : > { %p1502_p13 = pneg %p1486_p11 }
  0x1f   : > { %p1111_p0 = pnand %p1502_p13, %p1109_p12 }
  0x21   : > { %p1112_p3 = pneg %p1111_p0 }
  0x23   : > { %p1117_p7 = pnand %p1115_p5, %p1112_p3 }
  0x25   : > { %1120 = shalt.err (!%p1117_p7)
}
  0x26   : > { %s1121_s15 = scalar_lea.vmem %s1479_s11, 512  ;;  %p1129_p1 = scmp.lt.s32.totalorder %s1479_s11, %s1479_s11 }
  0x27   : > { %p1122_p9 = scmp.ne.s32.totalorder %s1479_s11, %s1121_s15  ;;  %p1130_p4 = scmp.lt.s32.totalorder %s1121_s15, %s1121_s15 }
  0x29   : > { %p1124_p10 = pnand %p1122_p9, %p1502_p13  ;;  %p1131_p12 = por %p1130_p4, %p1129_p1 }
  0x2b   : > { %p1125_p6 = pneg %p1124_p10 }
  0x2d   : > { %p1132_p0 = pnand %p1131_p12, %p1125_p6 }
  0x2f   : > { %1135 = shalt.err (!%p1132_p0)
}
  0x30   : > { %s1377_s17 = smov 128   ;;  %s1378_s18 = smov 8  }
  0x31   : > { %1018 = dma.hbm_to_vmem [thread:$0]  (!%p1486_p11), %s1813_s1, 512, %s1479_s11, [#allocation8], %s1377_s17, %s1377_s17, %s1378_s18  }
  0x32   : > { %s1136_s13 = scalar_lea.hbm %s1815_s3, 16 }
  0x33   : > { %p1137_p1 = scmp.ne.s32.totalorder %s1815_s3, %s1136_s13  ;;  %p1143_p10 = scmp.lt.u32.totalorder %s1136_s13, %s1815_s3 }
  0x35   : > { %p1139_p4 = pnand %p1137_p1, %p1502_p13 }
  0x37   : > { %p1140_p6 = pneg %p1139_p4 }
  0x39   : > { %p1145_p3 = pnand %p1143_p10, %p1140_p6 }
  0x3b   : > { %1148 = shalt.err (!%p1145_p3)
}
  0x3c   : > { %s1149_s11 = scalar_lea.vmem %s1490_s14, 16  ;;  %s1156_s8 = scalar_lea.vmem %s1490_s14, 32 }
  0x3d   : > { %p1150_p5 = scmp.ne.s32.totalorder %s1490_s14, %s1149_s11  ;;  %p1157_p12 = scmp.lt.s32.totalorder %s1490_s14, %s1490_s14 }
  0x3e   : > { %p1158_p0 = scmp.lt.s32.totalorder %s1156_s8, %s1149_s11 }
  0x3f   : > { %p1152_p7 = pnand %p1150_p5, %p1502_p13 }
  0x40   : > { %p1159_p1 = por %p1158_p0, %p1157_p12 }
  0x41   : > { %p1153_p9 = pneg %p1152_p7 }
  0x43   : > { %p1160_p4 = pnand %p1159_p1, %p1153_p9 }
  0x45   : > { %1163 = shalt.err (!%p1160_p4)
}
  0x46   : > { %1024 = dma.hbm_to_vmem [thread:$0]  (!%p1486_p11), %s1815_s3, 16, %s1490_s14, [#allocation11]  }
  0x47   : > { %s1164_s27 = scalar_lea.hbm %s1814_s2, 128 }
  0x48   : > { %p1165_p6 = scmp.ne.s32.totalorder %s1814_s2, %s1164_s27  ;;  %p1171_p5 = scmp.lt.u32.totalorder %s1164_s27, %s1814_s2 }
  0x4a   : > { %p1167_p10 = pnand %p1165_p6, %p1502_p13 }
  0x4c   : > { %p1168_p3 = pneg %p1167_p10 }
  0x4e   : > { %p1173_p7 = pnand %p1171_p5, %p1168_p3 }
  0x50   : > { %1176 = shalt.err (!%p1173_p7)
}
  0x51   : > { %s1177_s8 = scalar_lea.vmem %s236_s16, 128  ;;  %p1185_p1 = scmp.lt.s32.totalorder %s236_s16, %s236_s16 }
  0x52   : > { %p1178_p9 = scmp.ne.s32.totalorder %s236_s16, %s1177_s8  ;;  %p1186_p4 = scmp.lt.s32.totalorder %s1177_s8, %s1177_s8 }
  0x54   : > { %p1180_p12 = pnand %p1178_p9, %p1502_p13  ;;  %p1187_p8 = por %p1186_p4, %p1185_p1 }
  0x56   : > { %p1181_p0 = pneg %p1180_p12 }
  0x58   : > { %p1188_p2 = pnand %p1187_p8, %p1181_p0 }
  0x5a   : > { %1191 = shalt.err (!%p1188_p2)
}
  0x5b   : > { %1021 = dma.hbm_to_vmem [thread:$0]  (!%p1486_p11), %s1814_s2, 128, %s236_s16, [#allocation8]  }
  0x5c   : > { %s1379_s21 = smov [#allocation12]   ;;  %s1192_s10 = scalar_lea.hbm %s1816_s4, 16 }
  0x5d   : > { %s257_s19 = sshll.u32 %s1379_s21, 4  ;;  %p1193_p6 = scmp.ne.s32.totalorder %s1816_s4, %s1192_s10  ;;  %s258_s19 = int_to_ptr.vmem [resolvable:$true] %s257_s19 }
  0x5e   : > { %p1199_p10 = scmp.lt.u32.totalorder %s1192_s10, %s1816_s4 }
  0x5f   : > { %p1195_p2 = pnand %p1193_p6, %p1502_p13 }
  0x61   : > { %p1196_p8 = pneg %p1195_p2 }
  0x63   : > { %p1201_p3 = pnand %p1199_p10, %p1196_p8 }
  0x65   : > { %1204 = shalt.err (!%p1201_p3)
}
  0x66   : > { %s1205_s16 = scalar_lea.vmem %s258_s19, 16  ;;  %s1212_s14 = scalar_lea.vmem %s258_s19, 32 }
  0x67   : > { %p1206_p5 = scmp.ne.s32.totalorder %s258_s19, %s1205_s16  ;;  %p1213_p12 = scmp.lt.s32.totalorder %s258_s19, %s258_s19 }
  0x68   : > { %p1214_p0 = scmp.lt.s32.totalorder %s1212_s14, %s1205_s16 }
  0x69   : > { %p1208_p7 = pnand %p1206_p5, %p1502_p13 }
  0x6a   : > { %p1215_p1 = por %p1214_p0, %p1213_p12 }
  0x6b   : > { %p1209_p9 = pneg %p1208_p7 }
  0x6d   : > { %p1216_p4 = pnand %p1215_p1, %p1209_p9 }
  0x6f   : > { %1219 = shalt.err (!%p1216_p4)
}
  0x70   : > { %1027 = dma.hbm_to_vmem [thread:$0]  (!%p1486_p11), %s1816_s4, 16, %s258_s19, [#allocation11]  }
  0x71   : > { %s40_s28 = sadd.s32 1, %s1368_s25  ;;  %s49_s20 = sadd.s32 1, %s1360_s23 }
  0x72   : > { %p42_p13 = scmp.ge.s32.totalorder %s40_s28, 2  ;;  %p56_p6 = scmp.ne.s32.totalorder %s1360_s23, %s1356_s22 }
  0x73   : > { %p57_p2 = scmp.eq.s32.totalorder %s1372_s26, 0  ;;  %p1043_p8 = scmp.lt.s32.totalorder %s1372_s26, 2 }
  0x74   : > { %s1853_s28 = smov (%p42_p13, %s40_s28), 0  ;;  %p1836_p3 = scmp.ne.s32.totalorder %s1829_s30, 0 }
  0x75   : > { %p58_p10 = por %p57_p2, %p56_p6  ;;  %s44_s27 = ssub.s32 %s1368_s25, %s1853_s28 }
  0x76   : > { %p1597_p5 = por %p1836_p3, %p56_p6  ;;  %s268_s10 = sand.u32 1, %s1360_s23  }
  0x77   : > { %p47_p7 = scmp.eq.s32.totalorder %s44_s27, 0  ;;  %s917_s19 = sshll.u32 %s268_s10, 6 }
  0x78   : > { %s934_s13 = sshll.u32 %s1368_s25, 10  ;;  %s272_s30 = scalar_lea.vmem [#allocation4], %s917_s19 }
  0x79   : > { %s1606_s15 = scalar_select %p47_p7, %s1360_s23, %s49_s20  }
  0x7a   : > { %s1611_s16 = scalar_lea.hbm %s1812_s0, %s934_s13  ;;  %s281_s14 = sshll.u32 %s272_s30, 4  ;;  %s1619_s14 = int_to_ptr.vmem [resolvable:$true] %s281_s14 }
  0x7b   : > { %p1615_p11 = pnand %p1043_p8, %p58_p10  ;;  %s1621_s21 = scalar_lea.sflag [#allocation5], %s268_s10 }
  0x7c   : > { %s1220_s20 = scalar_lea.hbm %s1611_s16, 1024  ;;  %s1225_s13 = scalar_lea.hbm %s1812_s0, 2048 }
  0x7d   : > { %p1221_p9 = scmp.ne.s32.totalorder %s1611_s16, %s1220_s20  ;;  %p1222_p12 = pneg %p1615_p11 }
  0x7e   : > { %p1226_p4 = scmp.lt.u32.totalorder %s1611_s16, %s1812_s0  ;;  %p1227_p13 = scmp.lt.u32.totalorder %s1225_s13, %s1220_s20 }
  0x7f   : > { %p1223_p0 = pnand %p1222_p12, %p1221_p9  ;;  %p1229_p2 = scmp.lt.u32.totalorder %s1220_s20, %s1611_s16 }
  0x80   : > { %p1228_p6 = por %p1227_p13, %p1226_p4 }
  0x81   : > { %p1224_p1 = pneg %p1223_p0 }
  0x82   : > { %p1230_p8 = por %p1229_p2, %p1228_p6 }
  0x84   : > { %p1231_p10 = pnand %p1230_p8, %p1224_p1 }
  0x86   : > { %1234 = shalt.err (!%p1231_p10)
}
  0x87   : > { %s1235_s10 = scalar_lea.vmem %s1619_s14, 1024  ;;  %s1380_s30 = smov [#allocation4]  }
  0x88   : > { %p1236_p3 = scmp.ne.s32.totalorder %s1619_s14, %s1235_s10  ;;  %s1240_s27 = sshll.u32 %s1380_s30, 4  ;;  %s1241_s27 = int_to_ptr.vmem [resolvable:$false] %s1240_s27 }
  0x89   : > { %s1242_s19 = scalar_lea.vmem %s1241_s27, 2048  ;;  %p1243_p0 = scmp.lt.s32.totalorder %s1619_s14, %s1241_s27 }
  0x8a   : > { %p1238_p7 = pnand %p1236_p3, %p1222_p12  ;;  %p1244_p4 = scmp.lt.s32.totalorder %s1242_s19, %s1235_s10 }
  0x8c   : > { %p1239_p9 = pneg %p1238_p7  ;;  %p1245_p13 = por %p1244_p4, %p1243_p0 }
  0x8e   : > { %p1246_p6 = pnand %p1245_p13, %p1239_p9 }
  0x90   : > { %1249 = shalt.err (!%p1246_p6)
}
  0x91   : > { %1031 = dma.hbm_to_vmem [thread:$0]  (!%p1615_p11), %s1611_s16, 1024, %s1619_s14, %s1621_s21, %s1377_s17, %s1377_s17, %s1378_s18  }
  0x92   : > { %p1839_p12 = scmp.ne.s32.totalorder %s1833_s9, 0 }
  0x93   : > { %s1655_s20 = sand.u32 (!%p1839_p12), 1, %s1356_s22   ;;  %p1840_p1 = scmp.ne.s32.totalorder (!%p1839_p12), %s1830_s7, 0 }
  0x94   : > { %293 = sbr.rel (%p1839_p12) target bundleno = 686 (0x2ae), region = 40  ;;  %s921_s13 = sshll.u32 (!%p1839_p12), %s1655_s20, 6 }
  0x95   : > { %s296_s11 = scalar_lea.sflag (!%p1839_p12), [#allocation5], %s1655_s20  ;;  %s1659_s8 = scalar_lea.vmem (!%p1839_p12), [#allocation4], %s921_s13 }
  0x9b   : > { %1331 = dma.done.wait (%p1840_p1), %s296_s11, 1024  }
  0x9c   : > { %1333 = vsyncadd (%p1840_p1), %s296_s11, 4294966272  ;;  %p1841_p11 = scmp.ne.s32.totalorder %s1828_s29, 0 }
  0x9e   : > { %1335 = dma.done.wait (%p1841_p11), [#allocation8], 640  }
  0x9f   : > { %1337 = vsyncadd (%p1841_p11), [#allocation8], 4294966656 }
  0xa0   : > { %1339 = dma.done.wait (%p1841_p11), [#allocation11], 32  }
  0xa1   : > { %1341 = vsyncadd (%p1841_p11), [#allocation11], 4294967264  ;;  %vm352_vm0 = vcmask 253952   ;;  %v1381_v0 = vmov 0.0|0.0   ;;  %v1382_v1 = vmov 0.0   ;;  %vm1383_vm1 = vmmov 0  }
  0xa2   : > { %981 = vmatprep.subr.bf16.mxu0 %v1381_v0  ;;  %987 = vmatprep.subr.bf16.mxu1 %v1381_v0  ;;  %353 = vst.msk [vmem:[#allocation2] sm:$0x1] %vm352_vm0, %v1382_v1  ;;  %354 = vst.msk [vmem:[#allocation3] sm:$0x1] %vm352_vm0, %v1382_v1  ;;  %vm364_vm2 = vcmask 261120   ;;  %v424_v2 = vld [vmem:[#allocation7] sm:$0xff] }
  0xa3   : > { %957 = vmatprep.mubr.msk.f32.mxu0 %vm1383_vm1, %v1382_v1  ;;  %968 = vmatprep.mubr.msk.f32.mxu1 %vm1383_vm1, %v1382_v1  ;;  %v425_v3 = vld [vmem:[#allocation7 + $0x8] sm:$0xff]  ;;  %v426_v4 = vld [vmem:[#allocation7 + $0x10] sm:$0xff]  ;;  %v427_v6 = vld [vmem:[#allocation7 + $0x18] sm:$0xff]  ;;  %vm581_vm3 = vcmask 64512   ;;  %s930_s29 = sshll.u32 %s1364_s24, 4  ;;  %s340_s7 = scalar_lea.vmem [#allocation13], %s1655_s20 }
  0xa4   : > { %v982_v5 = vpack.c.bf16 %v425_v3, %v424_v2  ;;  %v355_v7 = vld [vmem:[%s1659_s8] sm:$0xff]  ;;  %v356_v8 = vld [vmem:[%s1659_s8 + $0x8] sm:$0xff]  ;;  %v357_v9 = vld [vmem:[%s1659_s8 + $0x10] sm:$0xff]  ;;  %v985_v14 = vpack.c.bf16 %v427_v6, %v426_v4  ;;  %s753_s9 = sshll.u32 %s340_s7, 4  ;;  %s1722_s16 = scalar_lea.hbm %s1817_s5, %s930_s29  ;;  %s1724_s9 = int_to_ptr.vmem [resolvable:$true] %s753_s9 }
  0xa5   : > { %v358_v10 = vld [vmem:[%s1659_s8 + $0x18] sm:$0xff]  ;;  %v365_v11 = vsel %vm364_vm2, %v355_v7, 0.0  ;;  %v366_v12 = vsel %vm364_vm2, %v356_v8, 0.0  ;;  %v390_v13 = vmul.f32 %v355_v7, %v355_v7  ;;  %v359_v15 = vld [vmem:[%s1659_s8 + $0x20] sm:$0xff]  ;;  %v368_v17 = vsel %vm364_vm2, %v357_v9, 0.0  ;;  %v360_v20 = vld [vmem:[%s1659_s8 + $0x28] sm:$0xff] }
  0xa6   : > { %983 = vmatpush3.bf16.msra.mxu0 %v982_v5  ;;  %989 = vmatpush3.bf16.msra.mxu1 %v982_v5  ;;  %v367_v16 = vadd.f32 %v366_v12, %v365_v11  ;;  %v370_v18 = vsel %vm364_vm2, %v358_v10, 0.0  ;;  %v391_v19 = vmul.f32 %v356_v8, %v356_v8  ;;  %v392_v22 = vmul.f32 %v357_v9, %v357_v9  ;;  %v361_v26 = vld [vmem:[%s1659_s8 + $0x30] sm:$0xff]  ;;  %v362_v33 = vld [vmem:[%s1659_s8 + $0x38] sm:$0xff]  ;;  %v428_v9 = vld [vmem:[#allocation9] sm:$0xff]  ;;  %s346_s14 = scalar_lea.vmem [#allocation14], %s1655_s20  ;;  %s737_s21 = scalar_lea.sflag [#allocation6], %s1655_s20 }
  0xa7   : > { %984 = vmatprep.subr.bf16.mxu0 %v1381_v0  ;;  %990 = vmatprep.subr.bf16.mxu1 %v1381_v0  ;;  %v393_v23 = vmul.f32 %v358_v10, %v358_v10  ;;  %v372_v24 = vsel %vm364_vm2, %v359_v15, 0.0  ;;  %v398_v25 = vsel %vm364_vm2, %v390_v13, 0.0  ;;  %v394_v28 = vmul.f32 %v359_v15, %v359_v15  ;;  %s1729_s6 = sshll.u32 %s346_s14, 4  ;;  %s1250_s10 = scalar_lea.vmem %s1724_s9, 16  ;;  %s1762_s6 = int_to_ptr.vmem [resolvable:$true] %s1729_s6 }
  0xa8   : > { %v369_v21 = vadd.f32 %v368_v17, %v367_v16  ;;  %v399_v29 = vsel %vm364_vm2, %v391_v19, 0.0  ;;  %v401_v30 = vsel %vm364_vm2, %v392_v22, 0.0  ;;  %v374_v31 = vsel %vm364_vm2, %v360_v20, 0.0  ;;  %v729_v22 = vld [vmem:[#allocation10] sm:$0x1]  ;;  %p1251_p2 = scmp.ne.s32.totalorder %s1724_s9, %s1250_s10  ;;  %s1384_s30 = smov [#allocation13]  }
  0xa9   : > { %v400_v32 = vadd.f32 %v399_v29, %v398_v25  ;;  %v395_v35 = vmul.f32 %v360_v20, %v360_v20  ;;  %v403_v36 = vsel %vm364_vm2, %v393_v23, 0.0  ;;  %v376_v37 = vsel %vm364_vm2, %v361_v26, 0.0  ;;  %v363_v61 = vld [vmem:[#allocation2] sm:$0x1]  ;;  %v389_v4 = vld [vmem:[#allocation3] sm:$0x1] }
  0xaa   : > { %986 = vmatpush3.bf16.msra.mxu0 %v985_v14  ;;  %992 = vmatpush3.bf16.msra.mxu1 %v985_v14  ;;  %v371_v27 = vadd.f32 %v370_v18, %v369_v21  ;;  %v396_v40 = vmul.f32 %v361_v26, %v361_v26  ;;  %v405_v41 = vsel %vm364_vm2, %v394_v28, 0.0  ;;  %v378_v42 = vsel %vm364_vm2, %v362_v33, 0.0  ;;  %v732_v25 = vld [vmem:[#allocation12] sm:$0x1]  ;;  %p1252_p8 = pnand %p1251_p2, %p1597_p5  ;;  %s1254_s27 = sshll.u32 %s1384_s30, 4  ;;  %s1255_s27 = int_to_ptr.vmem [resolvable:$false] %s1254_s27 }
  0xab   : > { %971 = vmatprep.subr.mxu0 %v1382_v1  ;;  %976 = vmatprep.subr.mxu1 %v1382_v1  ;;  %v402_v38 = vadd.f32 %v401_v30, %v400_v32  ;;  %v397_v45 = vmul.f32 %v362_v33, %v362_v33  ;;  %v407_v46 = vsel %vm364_vm2, %v395_v35, 0.0  ;;  %s1256_s19 = scalar_lea.vmem %s1255_s27, 32  ;;  %p1257_p3 = scmp.lt.s32.totalorder %s1724_s9, %s1255_s27 }
  0xac   : > { %v373_v34 = vadd.f32 %v372_v24, %v371_v27  ;;  %v409_v49 = vsel %vm364_vm2, %v396_v40, 0.0  ;;  %p1253_p10 = pneg %p1252_p8  ;;  %p1258_p7 = scmp.lt.s32.totalorder %s1256_s19, %s1250_s10 }
  0xad   : > { %v404_v43 = vadd.f32 %v403_v36, %v402_v38  ;;  %v411_v52 = vsel %vm364_vm2, %v397_v45, 0.0 }
  0xae   : > { %v375_v39 = vadd.f32 %v374_v31, %v373_v34  ;;  %p1259_p9 = por %p1258_p7, %p1257_p3 }
  0xaf   : > { %v406_v47 = vadd.f32 %v405_v41, %v404_v43 }
  0xb0   : > { %v377_v44 = vadd.f32 %v376_v37, %v375_v39  ;;  %p1260_p0 = pnand %p1259_p9, %p1253_p10 }
  0xb1   : > { %v408_v50 = vadd.f32 %v407_v46, %v406_v47 }
  0xb2   : > { %v379_v48 = vadd.f32 %v378_v42, %v377_v44 }
  0xb3   : > { %v410_v53 = vadd.f32 %v409_v49, %v408_v50 }
  0xb4   : > { %v380_v51 = vrot.slane %v379_v48, 4 }
  0xb5   : > { %v412_v55 = vadd.f32 %v411_v52, %v410_v53 }
  0xb6   : > { %v381_v54 = vadd.f32 %v380_v51, %v379_v48 }
  0xb7   : > { %v413_v57 = vrot.slane %v412_v55, 4 }
  0xb8   : > { %v382_v56 = vrot.slane %v381_v54, 2 }
  0xb9   : > { %v414_v59 = vadd.f32 %v413_v57, %v412_v55 }
  0xba   : > { %v383_v58 = vadd.f32 %v382_v56, %v381_v54 }
  0xbb   : > { %v415_v62 = vrot.slane %v414_v59, 2 }
  0xbc   : > { %v384_v60 = vrot.slane %v383_v58, 1 }
  0xbd   : > { %v416_v0 = vadd.f32 %v415_v62, %v414_v59 }
  0xbe   : > { %v385_v63 = vadd.f32 %v384_v60, %v383_v58 }
  0xbf   : > { %v417_v3 = vrot.slane %v416_v0, 1 }
  0xc0   : > { %v386_v2 = vadd.f32 %v385_v63, %v363_v61 }
  0xc1   : > { %v418_v5 = vadd.f32 %v417_v3, %v416_v0 }
  0xc2   : > { %388 = vst.msk [vmem:[#allocation2] sm:$0x1] %vm352_vm0, %v386_v2 }
  0xc3   : > { %v419_v6 = vadd.f32 %v418_v5, %v389_v4 }
  0xc5   : > { %420 = vst.msk [vmem:[#allocation3] sm:$0x1] %vm352_vm0, %v419_v6 }
  0xc9   : > { %v429_v7 = vld [vmem:[#allocation2] sm:$0x1] }
  0xca   : > { %958 = vmatmul.mubr.msk.f32.vlgmr.msra.gmra.mrb[0].mxu0 %vm364_vm2, %v429_v7 }
  0xcb   : > { %973 = vmatprep.mubr.msk.f32.mxu0 %vm1383_vm1, %v1382_v1  ;;  %972 = vmatpush3.msra.mxu0 %v428_v9 }
  0xcc   : > { %v503_v8 = vld [vmem:[#allocation3] sm:$0x1] }
  0xcd   : > { %969 = vmatmul.mubr.msk.f32.vlgmr.msra.gmra.mrb[0].mxu1 %vm364_vm2, %v503_v8 }
  0xce   : > { %978 = vmatprep.mubr.msk.f32.mxu1 %vm1383_vm1, %v1382_v1  ;;  %977 = vmatpush3.msra.mxu1 %v428_v9 }
 0x19d   : > { %v499_v10 = vpop.f32.mrb[0].mxu0 }
 0x19e   : > { %v577_v11 = vmul.f32 0.00390625, %v499_v10  ;;  %v959_v12 = vpop.f32.mrb[1].mxu0 }
 0x1a0   : > { %974 = vmatmul.mubr.msk.f32.vlgmr.msra.gmra.mrb[2].mxu0 %vm581_vm3, %v577_v11  ;;  %v579_v13 = vmul.f32 %v577_v11, %v577_v11  ;;  %v573_v14 = vpop.f32.mrb[0].mxu1 }
 0x1a1   : > { %v578_v15 = vmul.f32 0.00390625, %v573_v14  ;;  %v970_v16 = vpop.f32.mrb[1].mxu1 }
 0x1a3   : > { %v580_v17 = vsub.f32 %v578_v15, %v579_v13 }
 0x1a5   : > { %979 = vmatmul.mubr.msk.f32.vlgmr.msra.gmra.mrb[2].mxu1 %vm581_vm3, %v580_v17 }
 0x273   : > { %v651_v18 = vpop.f32.mrb[2].mxu0 }
 0x274   : > { %v975_v1 = vpop.f32.mrb[3].mxu0 }
 0x278   : > { %v724_v19 = vpop.f32.mrb[2].mxu1 }
 0x279   : > { %v725_v20 = vadd.f32 1e-05, %v724_v19  ;;  %v980_v21 = vpop.f32.mrb[3].mxu1 }
 0x27b   : > { %1106 = vrsqrt.f32 %v725_v20 }
 0x285   : > { %v1107_v23 = vpop.eup %1106 }
 0x286   : > { %v730_v24 = vmul.f32 %v1107_v23, %v729_v22 }
 0x288   : > { %v733_v26 = vmul.f32 %v730_v24, %v651_v18  ;;  %731 = vst.msk [vmem:[%s340_s7] sm:$0x1] %vm352_vm0, %v730_v24 }
 0x289   : > { %1263 = shalt.err (!%p1260_p0)
}
 0x28a   : > { %s1264_s13 = scalar_lea.hbm %s1722_s16, 16  ;;  %s1268_s7 = scalar_lea.hbm %s1817_s5, 32 }
 0x28b   : > { %p1265_p4 = scmp.ne.s32.totalorder %s1722_s16, %s1264_s13  ;;  %p1269_p12 = scmp.lt.u32.totalorder %s1722_s16, %s1817_s5 }
 0x28c   : > { %p1270_p1 = scmp.lt.u32.totalorder %s1268_s7, %s1264_s13  ;;  %p1272_p2 = scmp.lt.u32.totalorder %s1264_s13, %s1722_s16 }
 0x28d   : > { %p1266_p13 = pnand %p1265_p4, %p1597_p5 }
 0x28e   : > { %p1271_p11 = por %p1270_p1, %p1269_p12 }
 0x28f   : > { %p1267_p6 = pneg %p1266_p13 }
 0x290   : > { %p1273_p8 = por %p1272_p2, %p1271_p11 }
 0x292   : > { %p1274_p10 = pnand %p1273_p8, %p1267_p6 }
 0x294   : > { %1277 = shalt.err (!%p1274_p10)
}
 0x295   : > { %1011 = dma.vmem_to_hbm [thread:$0]  (%p1597_p5), %s1724_s9, 16, %s1722_s16, %s737_s21   ;;  %v734_v27 = vsub.f32 %v732_v25, %v733_v26 }
 0x296   : > { %s1842_s27 = sld [smem:[#allocation23_spill]]  ;;  %s741_s13 = scalar_lea.sflag [#allocation15], %s1655_s20 }
 0x297   : > { %735 = vst.msk [vmem:[%s346_s14] sm:$0x1] %vm352_vm0, %v734_v27  ;;  %s1278_s11 = scalar_lea.vmem %s1762_s6, 16  ;;  %s1385_s24 = smov [#allocation14]  }
 0x298   : > { %p1279_p3 = scmp.ne.s32.totalorder %s1762_s6, %s1278_s11  ;;  %s1282_s9 = sshll.u32 %s1385_s24, 4  ;;  %s1283_s9 = int_to_ptr.vmem [resolvable:$false] %s1282_s9 }
 0x299   : > { %s1284_s16 = scalar_lea.vmem %s1283_s9, 32  ;;  %p1285_p0 = scmp.lt.s32.totalorder %s1762_s6, %s1283_s9 }
 0x29a   : > { %p1280_p7 = pnand %p1279_p3, %p1597_p5  ;;  %p1286_p4 = scmp.lt.s32.totalorder %s1284_s16, %s1278_s11 }
 0x29c   : > { %s1759_s19 = scalar_lea.hbm %s1842_s27, %s930_s29  ;;  %p1281_p9 = pneg %p1280_p7 }
 0x29d   : > { %p1287_p13 = por %p1286_p4, %p1285_p0 }
 0x29f   : > { %p1288_p6 = pnand %p1287_p13, %p1281_p9 }
 0x2a1   : > { %1291 = shalt.err (!%p1288_p6)
}
 0x2a2   : > { %s1292_s20 = scalar_lea.hbm %s1759_s19, 16  ;;  %s1296_s21 = scalar_lea.hbm %s1842_s27, 32 }
 0x2a3   : > { %p1293_p12 = scmp.ne.s32.totalorder %s1759_s19, %s1292_s20  ;;  %p1297_p2 = scmp.lt.u32.totalorder %s1759_s19, %s1842_s27 }
 0x2a4   : > { %p1298_p8 = scmp.lt.u32.totalorder %s1296_s21, %s1292_s20  ;;  %p1300_p3 = scmp.lt.u32.totalorder %s1292_s20, %s1759_s19 }
 0x2a5   : > { %p1294_p1 = pnand %p1293_p12, %p1597_p5 }
 0x2a6   : > { %p1299_p10 = por %p1298_p8, %p1297_p2 }
 0x2a7   : > { %p1295_p11 = pneg %p1294_p1 }
 0x2a8   : > { %p1301_p7 = por %p1300_p3, %p1299_p10 }
 0x2aa   : > { %p1302_p9 = pnand %p1301_p7, %p1295_p11 }
 0x2ac   : > { %1305 = shalt.err (!%p1302_p9)
}
 0x2ad   : > { %1012 = dma.vmem_to_hbm [thread:$0]  (%p1597_p5), %s1762_s6, 16, %s1759_s19, %s741_s13  }
 0x2ae PF: > { %s1843_s17 = sld [smem:[#allocation21_spill]]  ;;  %s1844_s18 = sld [smem:[#allocation22_spill]] }
 0x2af   : > { %p1846_p4 = scmp.ge.s32.totalorder %s1372_s26, 2 }
 0x2b4   : > { %s778_s10 = sand.u32 1, %s1843_s17   ;;  %p1845_p0 = scmp.ne.s32.totalorder %s1844_s18, 0 }
 0x2b5   : > { %s779_s30 = scalar_lea.sflag [#allocation6], %s778_s10 }
 0x2b6   : > { %p1033_p13 = pnand %p1846_p4, %p1845_p0 }
 0x2b8   : > { %1343 = dma.done.wait (!%p1033_p13), %s779_s30, 16  }
 0x2b9   : > { %1345 = vsyncadd (!%p1033_p13), %s779_s30, 4294967280  ;;  %s787_s11 = scalar_lea.sflag [#allocation15], %s778_s10 }
 0x2ba   : > { %1347 = dma.done.wait (!%p1033_p13), %s787_s11, 16  }
 0x2bb   : > { %1349 = vsyncadd (!%p1033_p13), %s787_s11, 4294967280  ;;  %s28_s26 = sadd.s32 1, %s1372_s26   ;;  %s1847_s21 = smov %s1356_s22 }
 0x2bc   : > { %p25_p6 = scmp.ge.s32.totalorder %s28_s26, 4   ;;  %s1848_s22 = smov %s1360_s23 }
 0x2bd   : > { %s1849_s23 = smov %s1606_s15  ;;  %s1850_s24 = smov %s1368_s25 }
 0x2be   : > { %s1851_s25 = smov %s1853_s28  ;;  %27 = sbr.rel (!%p25_p6) target bundleno = 12 (0xc), region = 126 }
 0x2c5   :  { %791 = vsyncpa [#allocation5], 1 }
 0x2c6   :  { %793 = vsyncpa [#allocation5 + $0x1], 1 }
 0x2c7   :  { %794 = vsyncpa [#allocation8], 1 }
 0x2c8   :  { %795 = vsyncpa [#allocation11], 1 }
 0x2c9   :  { %796 = vsyncpa [#allocation6], 1 }
 0x2ca   :  { %798 = vsyncpa [#allocation6 + $0x1], 1 }
 0x2cb   :  { %799 = vsyncpa [#allocation15], 1 }
 0x2cc   :  { %801 = vsyncpa [#allocation15 + $0x1], 1 }

</bundles_post_ra>
